<compile_context>
chip_gen: v7x
topology: tpu7x:2x2x1
jax: 0.10.0
libtpu: 0.0.40
codegen_flags: <defaults>
</compile_context>

<pallas_src>
import math

import jax
import jax.numpy as jnp
from jax.experimental import pallas as pl
from jax.experimental.pallas import tpu as pltpu


def _mlp_kernel(x_ref, w1_ref, b1_ref, w2_ref, b2_ref, w3_ref, b3_ref, o_ref):
    # Feature-major: batch occupies the lane (last) dimension of every block.
    x = x_ref[...]                                                  # (4, TB)
    h1 = jnp.dot(w1_ref[...], x, preferred_element_type=jnp.float32) + b1_ref[...]
    h1 = jnp.maximum(h1, 0.0)                                       # ReLU(fc1)
    h2 = jnp.dot(w2_ref[...], h1, preferred_element_type=jnp.float32) + b2_ref[...]
    h2 = jnp.maximum(h2, 0.0)                                       # ReLU(fc2)
    o_ref[...] = (jnp.dot(w3_ref[...], h2, preferred_element_type=jnp.float32)
                  + b3_ref[...]).astype(o_ref.dtype)                # fc3, (3, TB)


def _round_up(n, m):
    return ((n + m - 1) // m) * m


def _choose_tile(batch, max_lanes=8192):
    """Lane-tile (batch) size: multiple of 128; >= 2 tiles when possible so
    both v7x TensorCores get work; capped at 8192 lanes (per-tile VMEM stays
    well under 1 MiB: x 4x8192, h 30x8192, out 3x8192, all f32)."""
    lanes = _round_up(batch, 128)
    if lanes <= 128:
        return 128
    return min(max_lanes, _round_up((lanes + 1) // 2, 128))


@jax.jit
def simplified_mlp(x, w1, b1, w2, b2, w3, b3):
    """x: (B, 4) float32 -> (B, 3) float32.

    Weights stay in PyTorch (out, in) layout (that is exactly what the
    feature-major W @ X formulation needs).  Biases become (out, 1) columns
    that broadcast across the lane/batch dimension inside the kernel.
    The x.T / out.T transposes are wrapper-side layout plumbing.
    """
    x = x.astype(jnp.float32)
    B, in_dim = x.shape
    hid1 = w1.shape[0]          # 30
    hid2 = w2.shape[0]          # 30
    out_dim = w3.shape[0]       # 3

    xT = x.T                                          # (in_dim, B), batch in lanes
    w1c = w1.astype(jnp.float32)                      # (hid1, in_dim)
    w2c = w2.astype(jnp.float32)                      # (hid2, hid1)
    w3c = w3.astype(jnp.float32)                      # (out_dim, hid2)
    b1c = b1.reshape(-1, 1).astype(jnp.float32)       # (hid1, 1)
    b2c = b2.reshape(-1, 1).astype(jnp.float32)       # (hid2, 1)
    b3c = b3.reshape(-1, 1).astype(jnp.float32)       # (out_dim, 1)

    TB = _choose_tile(B)
    grid = (pl.cdiv(B, TB),)   # ragged last tile handled by Pallas DMA clamping

    resident = lambda shape: pl.BlockSpec(shape, lambda i: (0, 0))

    outT = pl.pallas_call(
        _mlp_kernel,
        out_shape=jax.ShapeDtypeStruct((out_dim, B), jnp.float32),
        grid=grid,
        in_specs=[
            pl.BlockSpec((in_dim, TB), lambda i: (0, i)),   # x^T: tiled over batch lanes
            resident((hid1, in_dim)),                       # W1 (VMEM-resident)
            resident((hid1, 1)),                            # b1
            resident((hid2, hid1)),                         # W2
            resident((hid2, 1)),                            # b2
            resident((out_dim, hid2)),                      # W3
            resident((out_dim, 1)),                         # b3
        ],
        out_specs=pl.BlockSpec((out_dim, TB), lambda i: (0, i)),
        compiler_params=pltpu.CompilerParams(
            dimension_semantics=("parallel",),      # megacore sharding on v7x
            vmem_limit_bytes=32 * 1024 * 1024,      # generous; <1 MiB/tile needed
        ),
    )(xT, w1c, b1c, w2c, b2c, w3c, b3c)
    return outT.T                                     # (B, out_dim)


def _init_linear(key, out_features, in_features):
    # Deterministic init mirroring torch.nn.Linear default:
    # U(-1/sqrt(fan_in), 1/sqrt(fan_in)) for both weight and bias.
    kw, kb = jax.random.split(key)
    bound = 1.0 / math.sqrt(in_features)
    w = jax.random.uniform(kw, (out_features, in_features), jnp.float32, -bound, bound)
    b = jax.random.uniform(kb, (out_features,), jnp.float32, -bound, bound)
    return w, b


def _reference(x, w1, b1, w2, b2, w3, b3):
    h = jnp.maximum(x @ w1.T + b1, 0.0)
    h = jnp.maximum(h @ w2.T + b2, 0.0)
    return h @ w3.T + b3


if __name__ == "__main__":
    key = jax.random.PRNGKey(0)
    k_x, k_x2, k1, k2, k3 = jax.random.split(key, 5)

    w1, b1 = _init_linear(k1, 30, 4)
    w2, b2 = _init_linear(k2, 30, 30)
    w3, b3 = _init_linear(k3, 3, 30)

    # Small, deterministic example consistent with fc1's in_features=4.
    batch = 8
    x = jax.random.normal(k_x, (batch, 4), dtype=jnp.float32)
    out = jax.block_until_ready(simplified_mlp(x, w1, b1, w2, b2, w3, b3))
    ref = _reference(x, w1, b1, w2, b2, w3, b3)
    assert out.shape == (batch, 3)
    assert jnp.allclose(out, ref, atol=1e-5, rtol=1e-5)

    # Exercise the multi-tile grid + ragged (clamped) last tile, no padding.
    batch2 = 2000
    x2 = jax.random.normal(k_x2, (batch2, 4), dtype=jnp.float32)
    out2 = jax.block_until_ready(simplified_mlp(x2, w1, b1, w2, b2, w3, b3))
    ref2 = _reference(x2, w1, b1, w2, b2, w3, b3)
    assert out2.shape == (batch2, 3)
    assert jnp.allclose(out2, ref2, atol=1e-5, rtol=1e-5)

    print("KERNEL_OK")
</pallas_src>

<mosaic_0001>
module attributes {stable_mosaic.version = 11 : i64} {
  func.func @_mlp_kernel(%arg0: i32, %arg1: memref<4x128xf32, #tpu.memory_space<vmem>>, %arg2: memref<30x4xf32, #tpu.memory_space<vmem>>, %arg3: memref<30x1xf32, #tpu.memory_space<vmem>>, %arg4: memref<30x30xf32, #tpu.memory_space<vmem>>, %arg5: memref<30x1xf32, #tpu.memory_space<vmem>>, %arg6: memref<3x30xf32, #tpu.memory_space<vmem>>, %arg7: memref<3x1xf32, #tpu.memory_space<vmem>>, %arg8: memref<3x128xf32, #tpu.memory_space<vmem>>) attributes {dimension_semantics = [#tpu.dimension_semantics<parallel>], iteration_bounds = array<i64: 1>, scalar_prefetch = 0 : i64, scratch_operands = 0 : i64, tpu.core_type = #tpu.core_type<tc>, window_params = [{transform_indices = @transform_0, window_bounds = array<i64: 4, 128>}, {pipeline_mode = #tpu.pipeline_mode<synchronous>, transform_indices = @transform_1, window_bounds = array<i64: 30, 4>}, {pipeline_mode = #tpu.pipeline_mode<synchronous>, transform_indices = @transform_2, window_bounds = array<i64: 30, 1>}, {pipeline_mode = #tpu.pipeline_mode<synchronous>, transform_indices = @transform_3, window_bounds = array<i64: 30, 30>}, {pipeline_mode = #tpu.pipeline_mode<synchronous>, transform_indices = @transform_4, window_bounds = array<i64: 30, 1>}, {pipeline_mode = #tpu.pipeline_mode<synchronous>, transform_indices = @transform_5, window_bounds = array<i64: 3, 30>}, {pipeline_mode = #tpu.pipeline_mode<synchronous>, transform_indices = @transform_6, window_bounds = array<i64: 3, 1>}, {transform_indices = @transform_7, window_bounds = array<i64: 3, 128>}]} {
    %c0 = arith.constant 0 : index
    %c0_0 = arith.constant 0 : index
    %0 = vector.load %arg1[%c0, %c0_0] : memref<4x128xf32, #tpu.memory_space<vmem>>, vector<4x128xf32>
    %c0_1 = arith.constant 0 : index
    %c0_2 = arith.constant 0 : index
    %1 = vector.load %arg2[%c0_1, %c0_2] : memref<30x4xf32, #tpu.memory_space<vmem>>, vector<30x4xf32>
    %cst = arith.constant dense<0.000000e+00> : vector<30x128xf32>
    %2 = tpu.matmul %1, %0, %cst {dimension_numbers = #tpu.dot_dimension_numbers<[1], [0], [0], [1], [0, 0, 1, 1], [], []>} : vector<30x4xf32>, vector<4x128xf32>, vector<30x128xf32> -> vector<30x128xf32>
    %c0_3 = arith.constant 0 : index
    %c0_4 = arith.constant 0 : index
    %3 = vector.load %arg3[%c0_3, %c0_4] : memref<30x1xf32, #tpu.memory_space<vmem>>, vector<30x1xf32>
    %4 = vector.broadcast %3 : vector<30x1xf32> to vector<30x128xf32>
    %5 = arith.addf %2, %4 : vector<30x128xf32>
    %cst_5 = arith.constant 0.000000e+00 : f32
    %6 = vector.broadcast %cst_5 : f32 to vector<30x128xf32>
    %7 = arith.maximumf %5, %6 : vector<30x128xf32>
    %c0_6 = arith.constant 0 : index
    %c0_7 = arith.constant 0 : index
    %8 = vector.load %arg4[%c0_6, %c0_7] : memref<30x30xf32, #tpu.memory_space<vmem>>, vector<30x30xf32>
    %cst_8 = arith.constant dense<0.000000e+00> : vector<30x128xf32>
    %9 = tpu.matmul %8, %7, %cst_8 {dimension_numbers = #tpu.dot_dimension_numbers<[1], [0], [0], [1], [0, 0, 1, 1], [], []>} : vector<30x30xf32>, vector<30x128xf32>, vector<30x128xf32> -> vector<30x128xf32>
    %c0_9 = arith.constant 0 : index
    %c0_10 = arith.constant 0 : index
    %10 = vector.load %arg5[%c0_9, %c0_10] : memref<30x1xf32, #tpu.memory_space<vmem>>, vector<30x1xf32>
    %11 = vector.broadcast %10 : vector<30x1xf32> to vector<30x128xf32>
    %12 = arith.addf %9, %11 : vector<30x128xf32>
    %cst_11 = arith.constant 0.000000e+00 : f32
    %13 = vector.broadcast %cst_11 : f32 to vector<30x128xf32>
    %14 = arith.maximumf %12, %13 : vector<30x128xf32>
    %c0_12 = arith.constant 0 : index
    %c0_13 = arith.constant 0 : index
    %15 = vector.load %arg6[%c0_12, %c0_13] : memref<3x30xf32, #tpu.memory_space<vmem>>, vector<3x30xf32>
    %cst_14 = arith.constant dense<0.000000e+00> : vector<3x128xf32>
    %16 = tpu.matmul %15, %14, %cst_14 {dimension_numbers = #tpu.dot_dimension_numbers<[1], [0], [0], [1], [0, 0, 1, 1], [], []>} : vector<3x30xf32>, vector<30x128xf32>, vector<3x128xf32> -> vector<3x128xf32>
    %c0_15 = arith.constant 0 : index
    %c0_16 = arith.constant 0 : index
    %17 = vector.load %arg7[%c0_15, %c0_16] : memref<3x1xf32, #tpu.memory_space<vmem>>, vector<3x1xf32>
    %18 = vector.broadcast %17 : vector<3x1xf32> to vector<3x128xf32>
    %19 = arith.addf %16, %18 : vector<3x128xf32>
    %c0_17 = arith.constant 0 : index
    %c0_18 = arith.constant 0 : index
    %20 = vector.load %arg8[%c0_17, %c0_18] : memref<3x128xf32, #tpu.memory_space<vmem>>, vector<3x128xf32>
    tpu.vector_store %arg8[%c0_17, %c0_18], %19 {strides = array<i32>} : memref<3x128xf32, #tpu.memory_space<vmem>>, vector<3x128xf32>,
    return
  }
  func.func @transform_0(%arg0: i32) -> (i32, i32) {
    %c0_i32 = arith.constant 0 : i32
    %c0_i32_0 = arith.constant 0 : i32
    return %c0_i32, %arg0 : i32, i32
  }
  func.func @transform_1(%arg0: i32) -> (i32, i32) {
    %c0_i32 = arith.constant 0 : i32
    %c0_i32_0 = arith.constant 0 : i32
    %c0_i32_1 = arith.constant 0 : i32
    return %c0_i32, %c0_i32_0 : i32, i32
  }
  func.func @transform_2(%arg0: i32) -> (i32, i32) {
    %c0_i32 = arith.constant 0 : i32
    %c0_i32_0 = arith.constant 0 : i32
    %c0_i32_1 = arith.constant 0 : i32
    return %c0_i32, %c0_i32_0 : i32, i32
  }
  func.func @transform_3(%arg0: i32) -> (i32, i32) {
    %c0_i32 = arith.constant 0 : i32
    %c0_i32_0 = arith.constant 0 : i32
    %c0_i32_1 = arith.constant 0 : i32
    return %c0_i32, %c0_i32_0 : i32, i32
  }
  func.func @transform_4(%arg0: i32) -> (i32, i32) {
    %c0_i32 = arith.constant 0 : i32
    %c0_i32_0 = arith.constant 0 : i32
    %c0_i32_1 = arith.constant 0 : i32
    return %c0_i32, %c0_i32_0 : i32, i32
  }
  func.func @transform_5(%arg0: i32) -> (i32, i32) {
    %c0_i32 = arith.constant 0 : i32
    %c0_i32_0 = arith.constant 0 : i32
    %c0_i32_1 = arith.constant 0 : i32
    return %c0_i32, %c0_i32_0 : i32, i32
  }
  func.func @transform_6(%arg0: i32) -> (i32, i32) {
    %c0_i32 = arith.constant 0 : i32
    %c0_i32_0 = arith.constant 0 : i32
    %c0_i32_1 = arith.constant 0 : i32
    return %c0_i32, %c0_i32_0 : i32, i32
  }
  func.func @transform_7(%arg0: i32) -> (i32, i32) {
    %c0_i32 = arith.constant 0 : i32
    %c0_i32_0 = arith.constant 0 : i32
    return %c0_i32, %arg0 : i32, i32
  }
}

</mosaic_0001>

<bundles_post_ra>
// kernel: simplified_mlp.1
= control target key start
LH: loop header
LB: loop body
LE: loop exit
PB: predicated region body
PF: predicated region fallthrough
CT: control target
= control target key end

     0   :  { %vm69_vm0 = vcmask 1043456   ;;  %vm56_vm1 = vcmask 31744   ;;  %v506_v5 = vmov 0   ;;  %s640_s0 = inlined_call_operand.vmem [shape: f32[4,8], index: 0, kind: input, shape index: {}]   ;;  %s641_s1 = inlined_call_operand.vmem [shape: f32[30,4], index: 1, kind: input, shape index: {}]   ;;  %s642_s2 = inlined_call_operand.vmem [shape: f32[30,1], index: 2, kind: input, shape index: {}]   ;;  %s643_s3 = inlined_call_operand.vmem [shape: f32[30,30], index: 3, kind: input, shape index: {}]   ;;  %s644_s4 = inlined_call_operand.vmem [shape: f32[30,1], index: 4, kind: input, shape index: {}]   ;;  %s645_s5 = inlined_call_operand.vmem [shape: f32[3,30], index: 5, kind: input, shape index: {}]   ;;  %s646_s6 = inlined_call_operand.vmem [shape: f32[3,1], index: 6, kind: input, shape index: {}]   ;;  %s647_s7 = inlined_call_operand.hbm [shape: f32[3,8], index: 7, kind: output, shape index: {}]  }
   0x1   :  { %v27_v0 = vld [vmem:[%s640_s0] sm:$0xf]  ;;  %v29_v2 = vld [vmem:[%s641_s1 + $0x8] sm:$0xff]  ;;  %v30_v3 = vld [vmem:[%s641_s1 + $0x10] sm:$0xff]  ;;  %480 = vset.pattern.permute.xlu0 %v506_v5  ;;  %481 = vset.pattern.permute.xlu1 %v506_v5 }
   0x2   :  { %v28_v1 = vld [vmem:[%s641_s1] sm:$0xff]  ;;  %424 = vmatprep.subr.msk.mxu0 %vm69_vm0, %v27_v0  ;;  %v34_v6 = vld [vmem:[%s642_s2 + $0x10] sm:$0xff]  ;;  %v31_v7 = vld [vmem:[%s641_s1 + $0x18] sm:$0x3f] }
   0x3   :  { %426 = vmatprep.mubr.msk.f32.mxu0 %vm56_vm1, %v28_v1  ;;  %v32_v4 = vld [vmem:[%s642_s2] sm:$0xff]  ;;  %425 = vmatpush3.msk.msra.mxu0 %vm69_vm0, %v27_v0  ;;  %v33_v8 = vld [vmem:[%s642_s2 + $0x8] sm:$0xff] }
   0x4   :  { %427 = vmatmul.mubr.msk.f32.vlgmr.msra.gmra.mrb[0].mxu0 %vm56_vm1, %v29_v2  ;;  %38 = vperm.xlu0 %480, %v32_v4  }
   0x5   :  { %429 = vmatprep.mubr.msk.f32.mxu0 %vm56_vm1, %v30_v3 }
   0x6   :  { %12 = vsyncpa [#allocation3], 0  ;;  %48 = vperm.xlu1 %481, %v34_v6   ;;  %v35_v9 = vld [vmem:[%s642_s2 + $0x18] sm:$0x3f]  ;;  %v166_v10 = vld [vmem:[%s644_s4] sm:$0xff]  ;;  %vm190_vm2 = vcmask 244736  }
   0x7   :  { %v167_v11 = vld [vmem:[%s644_s4 + $0x8] sm:$0xff]  ;;  %v168_v12 = vld [vmem:[%s644_s4 + $0x10] sm:$0xff]  ;;  %v169_v13 = vld [vmem:[%s644_s4 + $0x18] sm:$0x3f]  ;;  %vm203_vm3 = vcmask 1045504   ;;  %vm507_vm4 = vmmov 1  }
   0x8   :  { %430 = vmatmul.mubr.msk.f32.gmra.mrb[2].mxu0 %vm56_vm1, %v31_v7  ;;  %43 = vperm.xlu0 %480, %v33_v8   ;;  %v297_v14 = vld [vmem:[%s646_s6] sm:$0x7]  ;;  %vm602_vm5 = vmpackc.low %vm203_vm3, %vm507_vm4  ;;  %v163_v35 = vld [vmem:[%s643_s3 + $0x8] sm:$0xff]  ;;  %v508_v38 = vmov 0.0|0.0   ;;  %vm509_vm6 = vmmov 0   ;;  %v510_v39 = vmov 0.0  }
   0x9   :  { %v162_v15 = vld [vmem:[%s643_s3] sm:$0xff]  ;;  %v164_v36 = vld [vmem:[%s643_s3 + $0x10] sm:$0xff]  ;;  %v165_v37 = vld [vmem:[%s643_s3 + $0x18] sm:$0x3f]  ;;  %467 = vmatprep.subr.bf16.mxu0 %v508_v38  ;;  %454 = vmatprep.mubr.msk.f32.mxu0 %vm509_vm6, %v510_v39  ;;  %s511_s10 = smov [#allocation2]  }
   0xa   :  { %53 = vperm.xlu1 %481, %v35_v9   ;;  %440 = vmatprep.mubr.msk.f32.mxu1 %vm190_vm2, %v162_v15  ;;  %v296_v58 = vld [vmem:[%s645_s5] sm:$0x7]  ;;  %s386_s0 = sshll.u32 %s511_s10, 4  ;;  %s387_s0 = int_to_ptr.vmem [resolvable:$true] %s386_s0 }
   0xb   :  { %s482_s11 = scalar_lea.vmem %s387_s0, 64  ;;  %p487_p1 = scmp.lt.s32.totalorder %s387_s0, %s387_s0 }
   0xc   :  { %172 = vperm.xlu0 %480, %v166_v10   ;;  %p483_p0 = scmp.ne.s32.totalorder %s387_s0, %s482_s11  ;;  %p488_p2 = scmp.lt.s32.totalorder %s482_s11, %s482_s11 }
   0xe   :  { %177 = vperm.xlu1 %481, %v167_v11   ;;  %p489_p3 = por %p488_p2, %p487_p1 }
  0x10   :  { %182 = vperm.xlu0 %480, %v168_v12   ;;  %p490_p4 = pnand %p489_p3, %p483_p0 }
  0x12   :  { %187 = vperm.xlu1 %481, %v169_v13  }
  0x14   :  { %300 = vperm.xlu0 %480, %v297_v14  }
  0x83   :  { %v39_v16 = vpop.permute.xlu0 %38 }
  0x85   :  { %v49_v17 = vpop.permute.xlu1 %48 }
  0x87   :  { %v44_v18 = vpop.permute.xlu0 %43 }
  0x89   :  { %v54_v24 = vpop.permute.xlu1 %53 }
  0x8b   :  { %v173_v41 = vpop.permute.xlu0 %172 }
  0x8d   :  { %v178_v40 = vpop.permute.xlu1 %177 }
  0x8f   :  { %v183_v50 = vpop.permute.xlu0 %182 }
  0x91   :  { %v188_v47 = vpop.permute.xlu1 %187 }
  0x93   :  { %v301_v59 = vpop.permute.xlu0 %300 }
  0xd7   :  { %v428_v19 = vpop.f32.mrb[0].mxu0 }
  0xd8   :  { %v145_v20 = vadd.f32 %v428_v19, %v44_v18  ;;  %v139_v21 = vpop.f32.mrb[1].mxu0 }
  0xd9   :  { %v140_v22 = vadd.f32 %v139_v21, %v39_v16 }
  0xda   :  { %v159_v23 = vmax.f32 %v145_v20, 0.0 }
  0xdb   :  { %v158_v25 = vmax.f32 %v140_v22, 0.0  ;;  %v431_v26 = vpop.f32.mrb[2].mxu0 }
  0xdc   :  { %v155_v27 = vadd.f32 %v431_v26, %v54_v24  ;;  %v149_v28 = vpop.f32.mrb[3].mxu0 }
  0xdd   :  { %v150_v29 = vadd.f32 %v149_v28, %v49_v17  ;;  %v457_v30 = vpack.c.bf16 %v159_v23, %v158_v25 }
  0xde   :  { %v161_v31 = vmax.f32 %v155_v27, 0.0 }
  0xdf   :  { %v160_v32 = vmax.f32 %v150_v29, 0.0  ;;  %458 = vmatprep.subr.bf16.mxu1 %v457_v30 }
  0xe0   :  { %460 = vmatpush3.bf16.msra.mxu1 %v457_v30 }
  0xe1   :  { %v461_v34 = vpack.c.bf16 %v161_v31, %v160_v32 }
  0xe3   :  { %463 = vmatprep.subr.msk.bf16.mxu1 %vm602_vm5, %v461_v34 }
  0xe4   :  { %466 = vmatpush3.bf16.msk.msra.mxu1 %vm602_vm5, %v461_v34 }
  0xe7   :  { %441 = vmatmul.mubr.msk.f32.vlgmr.msra.gmra.mrb[0].mxu1 %vm190_vm2, %v163_v35 }
  0xe8   :  { %443 = vmatprep.mubr.msk.f32.mxu1 %vm190_vm2, %v164_v36 }
  0xeb   :  { %444 = vmatmul.mubr.msk.f32.gmra.mrb[2].mxu1 %vm190_vm2, %v165_v37 }
 0x1ba   :  { %v442_v42 = vpop.f32.mrb[0].mxu1 }
 0x1bb   :  { %v279_v43 = vadd.f32 %v442_v42, %v178_v40  ;;  %v273_v44 = vpop.f32.mrb[1].mxu1 }
 0x1bc   :  { %v274_v45 = vadd.f32 %v273_v44, %v173_v41 }
 0x1bd   :  { %v293_v46 = vmax.f32 %v279_v43, 0.0 }
 0x1be   :  { %v292_v48 = vmax.f32 %v274_v45, 0.0  ;;  %v445_v49 = vpop.f32.mrb[2].mxu1 }
 0x1bf   :  { %v289_v51 = vadd.f32 %v445_v49, %v188_v47  ;;  %v283_v52 = vpop.f32.mrb[3].mxu1 }
 0x1c0   :  { %v468_v53 = vpack.c.bf16 %v293_v46, %v292_v48  ;;  %v284_v54 = vadd.f32 %v283_v52, %v183_v50 }
 0x1c1   :  { %v295_v55 = vmax.f32 %v289_v51, 0.0 }
 0x1c2   :  { %v294_v56 = vmax.f32 %v284_v54, 0.0  ;;  %469 = vmatpush3.bf16.msra.mxu0 %v468_v53 }
 0x1c3   :  { %470 = vmatprep.subr.bf16.mxu0 %v508_v38 }
 0x1c4   :  { %v471_v57 = vpack.c.bf16 %v295_v55, %v294_v56 }
 0x1c6   :  { %473 = vmatpush3.bf16.msk.msra.mxu0 %vm602_vm5, %v471_v57 }
 0x1c9   :  { %455 = vmatmul.mubr.msk.f32.vlgmr.msra.gmra.mrb[4].mxu0 %vm190_vm2, %v296_v58 }
 0x29c   :  { %v375_v60 = vpop.f32.mrb[4].mxu0 }
 0x29d   :  { %v376_v61 = vadd.f32 %v375_v60, %v301_v59  ;;  %v456_v62 = vpop.f32.mrb[5].mxu0 }
 0x29f   :  { %379 = vst [vmem:[#allocation2] sm:$0x7] %v376_v61 }
 0x2a0   :  { %493 = shalt.err (!%p490_p4)
}
 0x2a1   :  { %s494_s5 = scalar_lea.hbm %s647_s7, 64 }
 0x2a2   :  { %p495_p5 = scmp.ne.s32.totalorder %s647_s7, %s494_s5  ;;  %p498_p6 = scmp.lt.u32.totalorder %s494_s5, %s647_s7 }
 0x2a4   :  { %p500_p7 = pnand %p498_p6, %p495_p5 }
 0x2a6   :  { %503 = shalt.err (!%p500_p7)
}
 0x2a7   :  { %389 = dma.vmem_to_hbm [thread:$0]  %s387_s0, 64, %s647_s7, [#allocation3]  }
 0x2a8   :  { %504 = dma.done.wait [#allocation3], 64  }
 0x2a9   :  { %505 = vsyncadd [#allocation3], 4294967232 }
 0x2aa   :  { %393 = vsyncpa [#allocation3], 1 }

</bundles_post_ra>
